<compile_context>
chip_gen: v6e
topology: v6e:2x2x1
jax: 0.10.0
libtpu: 0.0.40
codegen_flags: <defaults>
</compile_context>

<pallas_src>
import jax
import jax.numpy as jnp
from jax.experimental import pallas as pl
from jax.experimental.pallas import tpu as pltpu


def _round_up(x, m):
    return -(-x // m) * m


def _choose_batch_block(batch, seq_len):
    """Pick (Bblk, B_pad): aim for ~512 fused-matmul rows per grid step."""
    target_rows = 512
    bblk = max(1, target_rows // max(seq_len, 1))
    if bblk >= batch:
        return batch, batch            # single grid step, block == full batch
    bblk = max(8, (bblk // 8) * 8)     # multiple of 8 -> clean (8,128) tiles
    b_pad = _round_up(batch, bblk)
    return bblk, b_pad


def _ticket_kernel(xw_ref, cw_ref, cb_ref, pool_ref, fw_ref, fb_ref, o_ref):
    # xw_ref  : (Bblk*L, Kp)   bf16  windowed activations [x[t-1]|x[t]|x[t+1]]
    # cw_ref  : (Kp, Ep)       bf16  fused conv weight
    # cb_ref  : (1, Ep)        f32   conv bias (zero in padded lanes)
    # pool_ref: (Bblk, Bblk*L) f32   per-batch mean matrix (1/L entries)
    # fw_ref  : (Ep, Tp)       f32   fc weight^T (zero padded)
    # fb_ref  : (1, Tp)        f32   fc bias (zero padded)
    # o_ref   : (Bblk, Tp)     f32
    conv = jnp.dot(xw_ref[...], cw_ref[...],
                   preferred_element_type=jnp.float32)            # (rows, Ep)
    conv = jnp.maximum(conv + cb_ref[...], 0.0)                   # bias + ReLU
    pooled = jnp.dot(pool_ref[...], conv,
                     preferred_element_type=jnp.float32)          # (Bblk, Ep)
    out = jnp.dot(pooled, fw_ref[...],
                  preferred_element_type=jnp.float32) + fb_ref[...]
    o_ref[...] = out


def ticket_classifier_forward(text, params, *, compute_dtype=jnp.bfloat16):
    """text: int32 (B, L) token ids.  Returns (B, target_size) float32."""
    emb = params["embedding"]          # (V, E)
    conv_w = params["conv_w"]          # (E, E, 3)  PyTorch (out, in, k)
    conv_b = params["conv_b"]          # (E,)
    fc_w = params["fc_w"]              # (T, E)     PyTorch (out, in)
    fc_b = params["fc_b"]              # (T,)

    B, L = text.shape
    E = emb.shape[1]
    T = fc_w.shape[0]

    Bblk, B_pad = _choose_batch_block(B, L)
    Kp = _round_up(3 * E, 128)         # lane-padded conv contraction dim (3E)
    Ep = _round_up(E, 128)             # lane-padded embed dim
    Tp = _round_up(T, 128)             # lane-padded target dim
    rows = Bblk * L                    # fused-matmul rows per grid step

    if B_pad != B:                     # padded batch rows are sliced off below
        text = jnp.pad(text, ((0, B_pad - B), (0, 0)))

    # --- glue: embedding gather + conv window construction ------------------
    # TODO(synk): for production-scale E/L, move the gather into the kernel
    # (scalar-prefetch token ids + DMA rows from the HBM embedding table) to
    # avoid materializing the (B*L, 3E) activation slab in HBM.
    embedded = jnp.take(emb, text, axis=0).astype(compute_dtype)   # (B_pad, L, E)
    zero = jnp.zeros((B_pad, 1, E), compute_dtype)
    x_m1 = jnp.concatenate([zero, embedded[:, :-1, :]], axis=1)    # x[t-1]
    x_p1 = jnp.concatenate([embedded[:, 1:, :], zero], axis=1)     # x[t+1]
    x_win = jnp.concatenate([x_m1, embedded, x_p1], axis=-1)       # (B_pad, L, 3E)
    x_win = jnp.pad(x_win, ((0, 0), (0, 0), (0, Kp - 3 * E)))
    x_win = x_win.reshape(B_pad * L, Kp)                           # (B_pad*L, Kp)

    # --- glue: parameter reshapes / lane padding -----------------------------
    # fused conv weight: row k*E + i, col o  <-  conv_w[o, i, k]
    cw = jnp.transpose(conv_w, (2, 1, 0)).reshape(3 * E, E)
    cw = jnp.pad(cw, ((0, Kp - 3 * E), (0, Ep - E))).astype(compute_dtype)
    cb = jnp.pad(conv_b.reshape(1, E).astype(jnp.float32),
                 ((0, 0), (0, Ep - E)))
    fw = jnp.pad(fc_w.T.astype(jnp.float32), ((0, Ep - E), (0, Tp - T)))
    fb = jnp.pad(fc_b.reshape(1, T).astype(jnp.float32),
                 ((0, 0), (0, Tp - T)))

    # per-batch mean over L as an MXU matmul (fetched into VMEM once; the
    # constant index_map keeps it resident across grid steps)
    row_batch = jnp.arange(rows, dtype=jnp.int32) // L
    pool = (row_batch[None, :] == jnp.arange(Bblk, dtype=jnp.int32)[:, None])
    pool = pool.astype(jnp.float32) * (1.0 / L)                    # (Bblk, rows)

    out = pl.pallas_call(
        _ticket_kernel,
        out_shape=jax.ShapeDtypeStruct((B_pad, Tp), jnp.float32),
        grid=(B_pad // Bblk,),
        in_specs=[
            pl.BlockSpec((rows, Kp), lambda i: (i, 0)),     # activation block
            pl.BlockSpec((Kp, Ep), lambda i: (0, 0)),       # fused conv weight
            pl.BlockSpec((1, Ep), lambda i: (0, 0)),        # conv bias
            pl.BlockSpec((Bblk, rows), lambda i: (0, 0)),   # pooling matrix
            pl.BlockSpec((Ep, Tp), lambda i: (0, 0)),       # fc weight^T
            pl.BlockSpec((1, Tp), lambda i: (0, 0)),        # fc bias
        ],
        out_specs=pl.BlockSpec((Bblk, Tp), lambda i: (i, 0)),
        compiler_params=pltpu.CompilerParams(
            dimension_semantics=("parallel",)),
    )(x_win, cw, cb, pool, fw, fb)

    return out[:B, :T]


def init_params(key, vocab_size, embed_dim, target_size):
    k1, k2, k3, k4, k5 = jax.random.split(key, 5)
    # Deterministic synthetic init mimicking PyTorch defaults.
    embedding = jax.random.normal(k1, (vocab_size, embed_dim), jnp.float32)
    conv_bound = 1.0 / (embed_dim * 3) ** 0.5
    conv_w = jax.random.uniform(k2, (embed_dim, embed_dim, 3), jnp.float32,
                                -conv_bound, conv_bound)
    conv_b = jax.random.uniform(k3, (embed_dim,), jnp.float32,
                                -conv_bound, conv_bound)
    fc_bound = 1.0 / embed_dim ** 0.5
    fc_w = jax.random.uniform(k4, (target_size, embed_dim), jnp.float32,
                              -fc_bound, fc_bound)
    fc_b = jax.random.uniform(k5, (target_size,), jnp.float32,
                              -fc_bound, fc_bound)
    return {"embedding": embedding, "conv_w": conv_w, "conv_b": conv_b,
            "fc_w": fc_w, "fc_b": fc_b}


def reference_forward(text, params):
    """Pure-JAX f32 reference replicating the PyTorch forward."""
    emb = jnp.take(params["embedding"], text, axis=0)            # (B, L, E)
    x = jnp.transpose(emb, (0, 2, 1))                            # (B, E, L)
    conv = jax.lax.conv_general_dilated(
        x, params["conv_w"], window_strides=(1,), padding=[(1, 1)],
        dimension_numbers=("NCH", "OIH", "NCH"))
    conv = conv + params["conv_b"][None, :, None]
    conv = jax.nn.relu(conv)
    pooled = jnp.mean(conv, axis=2)                              # (B, E)
    return pooled @ params["fc_w"].T + params["fc_b"]


if __name__ == "__main__":
    B, L, E, T, V = 2, 16, 32, 4, 64

    key = jax.random.PRNGKey(0)
    k_tok, k_param = jax.random.split(key)
    text = jax.random.randint(k_tok, (B, L), 0, V, dtype=jnp.int32)
    params = init_params(k_param, V, E, T)

    out = ticket_classifier_forward(text, params)
    out = jax.block_until_ready(out)

    ref = reference_forward(text, params)
    assert out.shape == (B, T)
    # Conv matmul operands are bf16 on the MXU -> relaxed tolerance vs the
    # f32 reference.
    assert jnp.allclose(out, ref, atol=2e-2, rtol=2e-2), (out, ref)

    print("KERNEL_OK")
</pallas_src>

<mosaic_0001>
module attributes {stable_mosaic.version = 11 : i64} {
  func.func @_ticket_kernel(%arg0: i32, %arg1: memref<32x128xbf16, #tpu.memory_space<vmem>>, %arg2: memref<128x128xbf16, #tpu.memory_space<vmem>>, %arg3: memref<1x128xf32, #tpu.memory_space<vmem>>, %arg4: memref<2x32xf32, #tpu.memory_space<vmem>>, %arg5: memref<128x128xf32, #tpu.memory_space<vmem>>, %arg6: memref<1x128xf32, #tpu.memory_space<vmem>>, %arg7: memref<2x128xf32, #tpu.memory_space<vmem>>) attributes {dimension_semantics = [#tpu.dimension_semantics<parallel>], iteration_bounds = array<i64: 1>, scalar_prefetch = 0 : i64, scratch_operands = 0 : i64, tpu.core_type = #tpu.core_type<tc>, window_params = [{transform_indices = @transform_0, window_bounds = array<i64: 32, 128>}, {pipeline_mode = #tpu.pipeline_mode<synchronous>, transform_indices = @transform_1, window_bounds = array<i64: 128, 128>}, {pipeline_mode = #tpu.pipeline_mode<synchronous>, transform_indices = @transform_2, window_bounds = array<i64: 1, 128>}, {pipeline_mode = #tpu.pipeline_mode<synchronous>, transform_indices = @transform_3, window_bounds = array<i64: 2, 32>}, {pipeline_mode = #tpu.pipeline_mode<synchronous>, transform_indices = @transform_4, window_bounds = array<i64: 128, 128>}, {pipeline_mode = #tpu.pipeline_mode<synchronous>, transform_indices = @transform_5, window_bounds = array<i64: 1, 128>}, {transform_indices = @transform_6, window_bounds = array<i64: 2, 128>}]} {
    %c0 = arith.constant 0 : index
    %c0_0 = arith.constant 0 : index
    %0 = vector.load %arg1[%c0, %c0_0] : memref<32x128xbf16, #tpu.memory_space<vmem>>, vector<32x128xbf16>
    %c0_1 = arith.constant 0 : index
    %c0_2 = arith.constant 0 : index
    %1 = vector.load %arg2[%c0_1, %c0_2] : memref<128x128xbf16, #tpu.memory_space<vmem>>, vector<128x128xbf16>
    %cst = arith.constant dense<0.000000e+00> : vector<32x128xf32>
    %2 = tpu.matmul %0, %1, %cst {dimension_numbers = #tpu.dot_dimension_numbers<[1], [0], [0], [1], [0, 0, 1, 1], [], []>} : vector<32x128xbf16>, vector<128x128xbf16>, vector<32x128xf32> -> vector<32x128xf32>
    %c0_3 = arith.constant 0 : index
    %c0_4 = arith.constant 0 : index
    %3 = vector.load %arg3[%c0_3, %c0_4] : memref<1x128xf32, #tpu.memory_space<vmem>>, vector<1x128xf32>
    %4 = vector.broadcast %3 : vector<1x128xf32> to vector<32x128xf32>
    %5 = arith.addf %2, %4 : vector<32x128xf32>
    %cst_5 = arith.constant 0.000000e+00 : f32
    %6 = vector.broadcast %cst_5 : f32 to vector<32x128xf32>
    %7 = arith.maximumf %5, %6 : vector<32x128xf32>
    %c0_6 = arith.constant 0 : index
    %c0_7 = arith.constant 0 : index
    %8 = vector.load %arg4[%c0_6, %c0_7] : memref<2x32xf32, #tpu.memory_space<vmem>>, vector<2x32xf32>
    %cst_8 = arith.constant dense<0.000000e+00> : vector<2x128xf32>
    %9 = tpu.matmul %8, %7, %cst_8 {dimension_numbers = #tpu.dot_dimension_numbers<[1], [0], [0], [1], [0, 0, 1, 1], [], []>} : vector<2x32xf32>, vector<32x128xf32>, vector<2x128xf32> -> vector<2x128xf32>
    %c0_9 = arith.constant 0 : index
    %c0_10 = arith.constant 0 : index
    %10 = vector.load %arg5[%c0_9, %c0_10] : memref<128x128xf32, #tpu.memory_space<vmem>>, vector<128x128xf32>
    %cst_11 = arith.constant dense<0.000000e+00> : vector<2x128xf32>
    %11 = tpu.matmul %9, %10, %cst_11 {dimension_numbers = #tpu.dot_dimension_numbers<[1], [0], [0], [1], [0, 0, 1, 1], [], []>} : vector<2x128xf32>, vector<128x128xf32>, vector<2x128xf32> -> vector<2x128xf32>
    %c0_12 = arith.constant 0 : index
    %c0_13 = arith.constant 0 : index
    %12 = vector.load %arg6[%c0_12, %c0_13] : memref<1x128xf32, #tpu.memory_space<vmem>>, vector<1x128xf32>
    %13 = vector.broadcast %12 : vector<1x128xf32> to vector<2x128xf32>
    %14 = arith.addf %11, %13 : vector<2x128xf32>
    %c0_14 = arith.constant 0 : index
    %c0_15 = arith.constant 0 : index
    %15 = vector.load %arg7[%c0_14, %c0_15] : memref<2x128xf32, #tpu.memory_space<vmem>>, vector<2x128xf32>
    tpu.vector_store %arg7[%c0_14, %c0_15], %14 {strides = array<i32>} : memref<2x128xf32, #tpu.memory_space<vmem>>, vector<2x128xf32>,
    return
  }
  func.func @transform_0(%arg0: i32) -> (i32, i32) {
    %c0_i32 = arith.constant 0 : i32
    %c0_i32_0 = arith.constant 0 : i32
    return %arg0, %c0_i32 : i32, i32
  }
  func.func @transform_1(%arg0: i32) -> (i32, i32) {
    %c0_i32 = arith.constant 0 : i32
    %c0_i32_0 = arith.constant 0 : i32
    %c0_i32_1 = arith.constant 0 : i32
    return %c0_i32, %c0_i32_0 : i32, i32
  }
  func.func @transform_2(%arg0: i32) -> (i32, i32) {
    %c0_i32 = arith.constant 0 : i32
    %c0_i32_0 = arith.constant 0 : i32
    %c0_i32_1 = arith.constant 0 : i32
    return %c0_i32, %c0_i32_0 : i32, i32
  }
  func.func @transform_3(%arg0: i32) -> (i32, i32) {
    %c0_i32 = arith.constant 0 : i32
    %c0_i32_0 = arith.constant 0 : i32
    %c0_i32_1 = arith.constant 0 : i32
    return %c0_i32, %c0_i32_0 : i32, i32
  }
  func.func @transform_4(%arg0: i32) -> (i32, i32) {
    %c0_i32 = arith.constant 0 : i32
    %c0_i32_0 = arith.constant 0 : i32
    %c0_i32_1 = arith.constant 0 : i32
    return %c0_i32, %c0_i32_0 : i32, i32
  }
  func.func @transform_5(%arg0: i32) -> (i32, i32) {
    %c0_i32 = arith.constant 0 : i32
    %c0_i32_0 = arith.constant 0 : i32
    %c0_i32_1 = arith.constant 0 : i32
    return %c0_i32, %c0_i32_0 : i32, i32
  }
  func.func @transform_6(%arg0: i32) -> (i32, i32) {
    %c0_i32 = arith.constant 0 : i32
    %c0_i32_0 = arith.constant 0 : i32
    return %arg0, %c0_i32 : i32, i32
  }
}

</mosaic_0001>

<bundles_post_ra>
// kernel: tpu_custom_call.1
= control target key start
LH: loop header
LB: loop body
LE: loop exit
PB: predicated region body
PF: predicated region fallthrough
CT: control target
= control target key end

     0   :  { %11 = vsyncpa [#allocation3], 0  ;;  %s698_s0 = inlined_call_operand.hbm [shape: bf16[32,128], index: 0, kind: input, shape index: {}]   ;;  %s699_s1 = inlined_call_operand.hbm [shape: bf16[128,128], index: 1, kind: input, shape index: {}]   ;;  %s700_s2 = inlined_call_operand.vmem [shape: f32[1,128], index: 2, kind: input, shape index: {}]   ;;  %s701_s3 = inlined_call_operand.vmem [shape: f32[2,32], index: 3, kind: input, shape index: {}]   ;;  %s702_s4 = inlined_call_operand.hbm [shape: f32[128,128], index: 4, kind: input, shape index: {}]   ;;  %s703_s5 = inlined_call_operand.vmem [shape: f32[1,128], index: 5, kind: input, shape index: {}]   ;;  %s704_s6 = inlined_call_operand.hbm [shape: f32[2,128], index: 6, kind: output, shape index: {}]  }
   0x1   :  { %12 = vsyncpa [#allocation6], 0 }
   0x2   :  { %13 = vsyncpa [#allocation4], 0  ;;  %s608_s21 = smov [#allocation5]   ;;  %s609_s23 = smov [#allocation2]  }
   0x3   :  { %s31_s22 = sshll.u32 %s608_s21, 4  ;;  %s19_s24 = sshll.u32 %s609_s23, 4  ;;  %s32_s22 = int_to_ptr.vmem [resolvable:$true] %s31_s22  ;;  %s20_s24 = int_to_ptr.vmem [resolvable:$true] %s19_s24 }
   0x4   :  { %s530_s25 = scalar_lea.vmem %s32_s22, 1024  ;;  %p535_p1 = scmp.lt.s32.totalorder %s32_s22, %s32_s22 }
   0x5   :  { %p531_p0 = scmp.ne.s32.totalorder %s32_s22, %s530_s25  ;;  %p536_p2 = scmp.lt.s32.totalorder %s530_s25, %s530_s25 }
   0x7   :  { %p537_p3 = por %p536_p2, %p535_p1 }
   0x9   :  { %p538_p4 = pnand %p537_p3, %p531_p0 }
   0xb   :  { %541 = shalt.err (!%p538_p4)
}
   0xc   :  { %s610_s26 = smov 64   ;;  %s611_s27 = smov 4  }
   0xd   :  { %37 = dma.hbm_to_vmem [thread:$0]  %s699_s1, 1024, %s32_s22, [#allocation6], %s610_s26, %s610_s26, %s611_s27  }
   0xe   :  { %s550_s30 = scalar_lea.vmem %s20_s24, 256  ;;  %p555_p6 = scmp.lt.s32.totalorder %s20_s24, %s20_s24 }
   0xf   :  { %p551_p5 = scmp.ne.s32.totalorder %s20_s24, %s550_s30  ;;  %p556_p7 = scmp.lt.s32.totalorder %s550_s30, %s550_s30 }
  0x11   :  { %p557_p8 = por %p556_p7, %p555_p6 }
  0x13   :  { %p558_p9 = pnand %p557_p8, %p551_p5 }
  0x15   :  { %561 = shalt.err (!%p558_p9)
}
  0x16   :  { %25 = dma.hbm_to_vmem [thread:$0]  %s698_s0, 256, %s20_s24, [#allocation3], %s610_s26, %s610_s26, %s611_s27  }
  0x17   :  { %s612_s9 = smov [#allocation7]  }
  0x18   :  { %s47_s10 = sshll.u32 %s612_s9, 4  ;;  %s48_s10 = int_to_ptr.vmem [resolvable:$true] %s47_s10 }
  0x19   :  { %s570_s11 = scalar_lea.vmem %s48_s10, 2048  ;;  %p575_p11 = scmp.lt.s32.totalorder %s48_s10, %s48_s10 }
  0x1a   :  { %p571_p10 = scmp.ne.s32.totalorder %s48_s10, %s570_s11  ;;  %p576_p12 = scmp.lt.s32.totalorder %s570_s11, %s570_s11 }
  0x1c   :  { %p577_p13 = por %p576_p12, %p575_p11 }
  0x1e   :  { %p578_p0 = pnand %p577_p13, %p571_p10 }
  0x20   :  { %581 = shalt.err (!%p578_p0)
}
  0x21   :  { %s613_s1 = smov 128   ;;  %s614_s12 = smov 8  }
  0x22   :  { %53 = dma.hbm_to_vmem [thread:$0]  %s702_s4, 2048, %s48_s10, [#allocation6], %s613_s1, %s613_s1, %s614_s12  }
  0x23   :  { %602 = dma.done.wait [#allocation3], 256  }
  0x24   :  { %603 = vsyncadd [#allocation3], 4294967040 }
  0x25   :  { %604 = dma.done.wait [#allocation6], 3072  }
  0x26   :  { %605 = vsyncadd [#allocation6], 4294964224  ;;  %v512_v0 = vld [vmem:[#allocation5 + $0x38] sm:$0xff]   ;;  %v513_v1 = vld [vmem:[#allocation5 + $0x30] sm:$0xff]   ;;  %v615_v10 = vmov 0.0   ;;  %vm616_vm0 = vmmov 0  }
  0x27   :  { %436 = vmatprep.subr.bf16.mxu0 %v512_v0  ;;  %v514_v2 = vld [vmem:[#allocation5 + $0x28] sm:$0xff]   ;;  %v515_v3 = vld [vmem:[#allocation5 + $0x20] sm:$0xff]   ;;  %v520_v4 = vld [vmem:[#allocation2] sm:$0xff]   ;;  %456 = vmatprep.subr.mxu1 %v615_v10  ;;  %vm207_vm1 = vcmask 261120   ;;  %s617_s17 = smov [#allocation8]  }
  0x28   :  { %437 = vmatpush3.bf16.msra.mxu0 %v512_v0  ;;  %452 = vmatprep.mubr.bf16.mxu0 %v520_v4  ;;  %v516_v5 = vld [vmem:[#allocation5 + $0x18] sm:$0xff]   ;;  %v517_v6 = vld [vmem:[#allocation5 + $0x10] sm:$0xff]   ;;  %v518_v7 = vld [vmem:[#allocation5 + $0x8] sm:$0xff]   ;;  %s381_s18 = sshll.u32 %s617_s17, 4  ;;  %s382_s18 = int_to_ptr.vmem [resolvable:$true] %s381_s18 }
  0x29   :  { %438 = vmatprep.subr.bf16.mxu0 %v513_v1  ;;  %v519_v8 = vld [vmem:[#allocation5] sm:$0xff]   ;;  %v521_v9 = vld [vmem:[#allocation2 + $0x8] sm:$0xff]   ;;  %464 = vmatprep.mubr.msk.f32.mxu1 %vm616_vm0, %v615_v10  ;;  %v391_v12 = vld [vmem:[%s700_s2] ss:$0 sm:$0xff]  ;;  %s582_s19 = scalar_lea.vmem %s382_s18, 32  ;;  %p587_p2 = scmp.lt.s32.totalorder %s382_s18, %s382_s18 }
  0x2a   :  { %v206_v24 = vld [vmem:[%s701_s3] sm:$0x3]  ;;  %v296_v25 = vld [vmem:[#allocation7 + $0x78] sm:$0xff]  ;;  %v294_v27 = vld [vmem:[#allocation7 + $0x68] sm:$0xff]  ;;  %p583_p1 = scmp.ne.s32.totalorder %s382_s18, %s582_s19  ;;  %p588_p3 = scmp.lt.s32.totalorder %s582_s19, %s582_s19 }
  0x2b   :  { %v295_v26 = vld [vmem:[#allocation7 + $0x70] sm:$0xff]  ;;  %v293_v28 = vld [vmem:[#allocation7 + $0x60] sm:$0xff]  ;;  %v292_v29 = vld [vmem:[#allocation7 + $0x58] sm:$0xff] }
  0x2c   :  { %439 = vmatpush3.bf16.msra.mxu0 %v513_v1  ;;  %v291_v30 = vld [vmem:[#allocation7 + $0x50] sm:$0xff]  ;;  %v290_v31 = vld [vmem:[#allocation7 + $0x48] sm:$0xff]  ;;  %v289_v32 = vld [vmem:[#allocation7 + $0x40] sm:$0xff]  ;;  %p589_p4 = por %p588_p3, %p587_p2 }
  0x2d   :  { %440 = vmatprep.subr.bf16.mxu0 %v514_v2  ;;  %v288_v33 = vld [vmem:[#allocation7 + $0x38] sm:$0xff]  ;;  %v287_v34 = vld [vmem:[#allocation7 + $0x30] sm:$0xff]  ;;  %v286_v35 = vld [vmem:[#allocation7 + $0x28] sm:$0xff] }
  0x2e   :  { %v285_v36 = vld [vmem:[#allocation7 + $0x20] sm:$0xff]  ;;  %v284_v37 = vld [vmem:[#allocation7 + $0x18] sm:$0xff]  ;;  %v283_v38 = vld [vmem:[#allocation7 + $0x10] sm:$0xff]  ;;  %p590_p5 = pnand %p589_p4, %p583_p1 }
  0x2f   :  { %v282_v39 = vld [vmem:[#allocation7 + $0x8] sm:$0xff]  ;;  %v281_v40 = vld [vmem:[#allocation7] sm:$0xff]  ;;  %v403_v43 = vld [vmem:[%s703_s5] ss:$0 sm:$0xff] }
  0x30   :  { %441 = vmatpush3.bf16.msra.mxu0 %v514_v2 }
  0x31   :  { %442 = vmatprep.subr.bf16.mxu0 %v515_v3 }
  0x34   :  { %443 = vmatpush3.bf16.msra.mxu0 %v515_v3 }
  0x35   :  { %444 = vmatprep.subr.bf16.mxu0 %v516_v5 }
  0x38   :  { %445 = vmatpush3.bf16.msra.mxu0 %v516_v5 }
  0x39   :  { %446 = vmatprep.subr.bf16.mxu0 %v517_v6 }
  0x3c   :  { %447 = vmatpush3.bf16.msra.mxu0 %v517_v6 }
  0x3d   :  { %448 = vmatprep.subr.bf16.mxu0 %v518_v7 }
  0x40   :  { %449 = vmatpush3.bf16.msra.mxu0 %v518_v7 }
  0x41   :  { %450 = vmatprep.subr.bf16.mxu0 %v519_v8 }
  0x44   :  { %451 = vmatpush3.bf16.msra.mxu0 %v519_v8 }
  0x47   :  { %453 = vmatmul.mubr.bf16.vlgmr.msra.gmra.mxu0 %v521_v9 }
 0x107   :  { %v454_v11 = vpop.f32.mrf.mxu0 }
 0x108   :  { %v196_v15 = vadd.f32 %v454_v11, %v391_v12 }
 0x109   :  { %v187_v13 = vpop.f32.mrf.mxu0 }
 0x10a   :  { %v204_v20 = vmax.f32 %v196_v15, 0.0  ;;  %v188_v21 = vadd.f32 %v391_v12, %v187_v13 }
 0x10b   :  { %v455_v14 = vpop.f32.mrf.mxu0 }
 0x10c   :  { %v199_v16 = vadd.f32 %v455_v14, %v391_v12  ;;  %v202_v23 = vmax.f32 %v188_v21, 0.0 }
 0x10d   :  { %v190_v17 = vpop.f32.mrf.mxu0 }
 0x10e   :  { %v205_v18 = vmax.f32 %v199_v16, 0.0  ;;  %v191_v19 = vadd.f32 %v391_v12, %v190_v17 }
 0x110   :  { %457 = vmatpush3.msra.mxu1 %v205_v18  ;;  %v203_v22 = vmax.f32 %v191_v19, 0.0 }
 0x111   :  { %458 = vmatprep.subr.mxu1 %v615_v10 }
 0x112   :  { %459 = vmatpush3.msra.mxu1 %v204_v20 }
 0x113   :  { %460 = vmatprep.subr.mxu1 %v615_v10 }
 0x114   :  { %461 = vmatpush3.msra.mxu1 %v203_v22 }
 0x115   :  { %462 = vmatprep.subr.mxu1 %v615_v10 }
 0x116   :  { %463 = vmatpush3.msra.mxu1 %v202_v23 }
 0x117   :  { %465 = vmatmul.mubr.msk.f32.vlgmr.msra.gmra.mxu1 %vm207_vm1, %v206_v24  ;;  %467 = vmatprep.subr.mxu1 %v615_v10 }
 0x118   :  { %468 = vmatpush3.msra.mxu1 %v296_v25  ;;  %499 = vmatprep.mubr.msk.f32.mxu1 %vm616_vm0, %v615_v10 }
 0x119   :  { %469 = vmatprep.subr.mxu1 %v615_v10 }
 0x11a   :  { %470 = vmatpush3.msra.mxu1 %v295_v26 }
 0x11b   :  { %471 = vmatprep.subr.mxu1 %v615_v10 }
 0x11c   :  { %472 = vmatpush3.msra.mxu1 %v294_v27 }
 0x11d   :  { %473 = vmatprep.subr.mxu1 %v615_v10 }
 0x11e   :  { %474 = vmatpush3.msra.mxu1 %v293_v28 }
 0x11f   :  { %475 = vmatprep.subr.mxu1 %v615_v10 }
 0x120   :  { %476 = vmatpush3.msra.mxu1 %v292_v29 }
 0x121   :  { %477 = vmatprep.subr.mxu1 %v615_v10 }
 0x122   :  { %478 = vmatpush3.msra.mxu1 %v291_v30 }
 0x123   :  { %479 = vmatprep.subr.mxu1 %v615_v10 }
 0x124   :  { %480 = vmatpush3.msra.mxu1 %v290_v31 }
 0x125   :  { %481 = vmatprep.subr.mxu1 %v615_v10 }
 0x126   :  { %482 = vmatpush3.msra.mxu1 %v289_v32 }
 0x127   :  { %483 = vmatprep.subr.mxu1 %v615_v10 }
 0x128   :  { %484 = vmatpush3.msra.mxu1 %v288_v33 }
 0x129   :  { %485 = vmatprep.subr.mxu1 %v615_v10 }
 0x12a   :  { %486 = vmatpush3.msra.mxu1 %v287_v34 }
 0x12b   :  { %487 = vmatprep.subr.mxu1 %v615_v10 }
 0x12c   :  { %488 = vmatpush3.msra.mxu1 %v286_v35 }
 0x12d   :  { %489 = vmatprep.subr.mxu1 %v615_v10 }
 0x12e   :  { %490 = vmatpush3.msra.mxu1 %v285_v36 }
 0x12f   :  { %491 = vmatprep.subr.mxu1 %v615_v10 }
 0x130   :  { %492 = vmatpush3.msra.mxu1 %v284_v37 }
 0x131   :  { %493 = vmatprep.subr.mxu1 %v615_v10 }
 0x132   :  { %494 = vmatpush3.msra.mxu1 %v283_v38 }
 0x133   :  { %495 = vmatprep.subr.mxu1 %v615_v10 }
 0x134   :  { %496 = vmatpush3.msra.mxu1 %v282_v39 }
 0x135   :  { %497 = vmatprep.subr.mxu1 %v615_v10 }
 0x136   :  { %498 = vmatpush3.msra.mxu1 %v281_v40 }
 0x1d7   :  { %v277_v41 = vpop.f32.mrf.mxu1 }
 0x1d8   :  { %500 = vmatmul.mubr.f32.vlgmr.msra.gmra.mxu1 %v277_v41 }
 0x1d9   :  { %v466_v42 = vpop.f32.mrf.mxu1 }
 0x298   :  { %v370_v44 = vpop.f32.mrf.mxu1 }
 0x299   :  { %v371_v45 = vadd.f32 %v403_v43, %v370_v44 }
 0x29a   :  { %v501_v46 = vpop.f32.mrf.mxu1 }
 0x29b   :  { %374 = vst [vmem:[#allocation8] sm:$0x3] %v371_v45 }
 0x29c   :  { %593 = shalt.err (!%p590_p5)
}
 0x29d   :  { %384 = dma.vmem_to_hbm [thread:$0]  %s382_s18, 32, %s704_s6, [#allocation4]  }
 0x29e   :  { %606 = dma.done.wait [#allocation4], 32  }
 0x29f   :  { %607 = vsyncadd [#allocation4], 4294967264 }
 0x2a0   :  { %388 = vsyncpa [#allocation3], 1 }
 0x2a1   :  { %389 = vsyncpa [#allocation6], 1 }
 0x2a2   :  { %390 = vsyncpa [#allocation4], 1 }

</bundles_post_ra>
